<compile_context>
chip_gen: v7x
topology: tpu7x:2x2x1
jax: 0.10.0
libtpu: 0.0.40
codegen_flags: <defaults>
</compile_context>

<pallas_src>
import jax
import jax.numpy as jnp
from jax.experimental import pallas as pl
from jax.experimental.pallas import tpu as pltpu


def _block_matmul_kernel(w_ref, x_ref, o_ref):
    # w_ref: (G, bd, bd)   G diagonal blocks
    # x_ref: (G, bd, TN)   matching row-slices of the input, one N-tile
    # o_ref: (G, bd, TN)   matching row-slices of the output
    o_ref[...] = jnp.einsum(
        "gij,gjn->gin",
        w_ref[...],
        x_ref[...],
        preferred_element_type=jnp.float32,
    ).astype(o_ref.dtype)


def _choose_n_tile(n: int, target_tn: int = 512) -> int:
    """Lane-dense N tile (multiple of 128) when possible, else the full N."""
    if n < 128:
        return n  # block dim == full array dim is legal for small last dims
    tn = min(target_tn, n)
    return max(128, (tn // 128) * 128)


def _choose_group(nb: int, bd: int, tn: int, in_itemsize: int,
                  out_itemsize: int, vmem_budget_bytes: int) -> int:
    """Largest divisor of nb whose double-buffered tiles fit the VMEM budget."""
    per_block = 2 * (bd * bd * in_itemsize        # weight (double-buffered)
                     + bd * tn * in_itemsize      # input tile
                     + bd * tn * out_itemsize)    # output tile
    g = max(1, vmem_budget_bytes // max(per_block, 1))
    g = int(min(g, nb))
    while nb % g != 0:   # keep the grid exact (no ragged last group)
        g -= 1
    return g


def block_linear(blocks: jax.Array, x: jax.Array, *,
                 compute_dtype=jnp.bfloat16,
                 target_tn: int = 512,
                 vmem_budget_bytes: int = 32 * 1024 * 1024) -> jax.Array:
    """out = block_diag(*blocks) @ x

    blocks: (num_blocks, bd, bd)
    x:      (D, N) with D == num_blocks * bd
    returns (D, N) in x.dtype (matmul inputs are cast to `compute_dtype`,
    accumulation is f32).
    """
    nb, bd, bd2 = blocks.shape
    assert bd == bd2, "blocks must be square"
    D, N = x.shape
    assert D == nb * bd, "input row dim must equal sum of block dims"

    out_dtype = x.dtype
    in_itemsize = jnp.dtype(compute_dtype).itemsize
    out_itemsize = jnp.dtype(out_dtype).itemsize

    # N tiling (lane-dense when possible); pad N up to a multiple of the tile.
    tn = _choose_n_tile(N, target_tn)
    n_pad = int(pl.cdiv(N, tn)) * tn

    # glue: cast + view the input as per-block row groups (no compute here)
    w = blocks.astype(compute_dtype)
    xb = x.astype(compute_dtype).reshape(nb, bd, N)
    if n_pad != N:
        xb = jnp.pad(xb, ((0, 0), (0, 0), (0, n_pad - N)))

    # Blocks-per-step group size, bounded by an explicit VMEM budget so the
    # same tiling is safe on v7x (64 MiB VMEM) as well as v5e/v6e (128 MiB).
    g = _choose_group(nb, bd, tn, in_itemsize, out_itemsize, vmem_budget_bytes)

    # N-tile axis innermost so the weight group stays VMEM-resident across it.
    grid = (nb // g, n_pad // tn)

    cost = pl.CostEstimate(
        flops=2 * nb * bd * bd * n_pad,
        transcendentals=0,
        bytes_accessed=(nb * bd * bd * in_itemsize
                        + nb * bd * n_pad * in_itemsize
                        + nb * bd * n_pad * out_itemsize),
    )

    out_blocks = pl.pallas_call(
        _block_matmul_kernel,
        out_shape=jax.ShapeDtypeStruct((nb, bd, n_pad), out_dtype),
        grid=grid,
        in_specs=[
            # weights: independent of the N-tile index j -> resident across j
            pl.BlockSpec((g, bd, bd), lambda i, j: (i, 0, 0)),
            pl.BlockSpec((g, bd, tn), lambda i, j: (i, 0, j)),
        ],
        out_specs=pl.BlockSpec((g, bd, tn), lambda i, j: (i, 0, j)),
        compiler_params=pltpu.CompilerParams(
            dimension_semantics=("parallel", "parallel"),
            vmem_limit_bytes=48 * 1024 * 1024,
        ),
        cost_estimate=cost,
    )(w, xb)

    out = out_blocks.reshape(D, n_pad)
    if n_pad != N:
        out = out[:, :N]
    return out
    # TODO(synk): bias path of the PyTorch module only broadcasts cleanly for
    # 1-D inputs; module default is bias=False so it is omitted here.


if __name__ == "__main__":
    key = jax.random.PRNGKey(0)
    k_w, k_x = jax.random.split(key)

    num_blocks, bd, N = 4, 8, 16          # block_dims = [[8, 8]] * 4
    D = num_blocks * bd                   # 32

    # deterministic "torch.randn"-style parameter init
    blocks = jax.random.normal(k_w, (num_blocks, bd, bd), dtype=jnp.float32)
    x = jax.random.normal(k_x, (D, N), dtype=jnp.float32)

    # pure-JAX reference: materialize block_diag and matmul
    full = jax.scipy.linalg.block_diag(*[blocks[i] for i in range(num_blocks)])
    ref = full @ x

    # f32 compute path: numerically faithful to the PyTorch forward
    out_f32 = jax.block_until_ready(
        block_linear(blocks, x, compute_dtype=jnp.float32))
    assert out_f32.shape == (D, N)
    assert jnp.allclose(out_f32, ref, atol=1e-5, rtol=1e-5)

    # default bf16-input path (the HBM-bandwidth-bound fast path); f32 accum
    out_bf16 = jax.block_until_ready(block_linear(blocks, x))
    assert out_bf16.shape == (D, N)
    assert jnp.allclose(out_bf16, ref, atol=5e-2, rtol=5e-2)

    print("KERNEL_OK")
</pallas_src>

<mosaic_0001>
module attributes {stable_mosaic.version = 11 : i64} {
  func.func @_block_matmul_kernel(%arg0: i32, %arg1: i32, %arg2: memref<4x8x8xf32, #tpu.memory_space<vmem>>, %arg3: memref<4x8x16xf32, #tpu.memory_space<vmem>>, %arg4: memref<4x8x16xf32, #tpu.memory_space<vmem>>) attributes {dimension_semantics = [#tpu.dimension_semantics<parallel>, #tpu.dimension_semantics<parallel>], iteration_bounds = array<i64: 1, 1>, scalar_prefetch = 0 : i64, scratch_operands = 0 : i64, tpu.core_type = #tpu.core_type<tc>, window_params = [{transform_indices = @transform_0, window_bounds = array<i64: 4, 8, 8>}, {transform_indices = @transform_1, window_bounds = array<i64: 4, 8, 16>}, {transform_indices = @transform_2, window_bounds = array<i64: 4, 8, 16>}]} {
    %c0 = arith.constant 0 : index
    %c0_0 = arith.constant 0 : index
    %c0_1 = arith.constant 0 : index
    %0 = vector.load %arg2[%c0, %c0_0, %c0_1] : memref<4x8x8xf32, #tpu.memory_space<vmem>>, vector<4x8x8xf32>
    %c0_2 = arith.constant 0 : index
    %c0_3 = arith.constant 0 : index
    %c0_4 = arith.constant 0 : index
    %1 = vector.load %arg3[%c0_2, %c0_3, %c0_4] : memref<4x8x16xf32, #tpu.memory_space<vmem>>, vector<4x8x16xf32>
    "tpu.trace_start"() <{level = 10 : i32, message = "gij,gjn->gin"}> : () -> ()
    %cst = arith.constant dense<0.000000e+00> : vector<4x8x16xf32>
    %2 = tpu.matmul %0, %1, %cst {dimension_numbers = #tpu.dot_dimension_numbers<[2], [1], [1], [2], [0, 0, 0, 1, 1, 2], [0], [0]>} : vector<4x8x8xf32>, vector<4x8x16xf32>, vector<4x8x16xf32> -> vector<4x8x16xf32>
    "tpu.trace_stop"() : () -> ()
    %c0_5 = arith.constant 0 : index
    %c0_6 = arith.constant 0 : index
    %c0_7 = arith.constant 0 : index
    %3 = vector.load %arg4[%c0_5, %c0_6, %c0_7] : memref<4x8x16xf32, #tpu.memory_space<vmem>>, vector<4x8x16xf32>
    tpu.vector_store %arg4[%c0_5, %c0_6, %c0_7], %2 {strides = array<i32>} : memref<4x8x16xf32, #tpu.memory_space<vmem>>, vector<4x8x16xf32>,
    return
  }
  func.func @transform_0(%arg0: i32, %arg1: i32) -> (i32, i32, i32) {
    %c0_i32 = arith.constant 0 : i32
    %c0_i32_0 = arith.constant 0 : i32
    %c0_i32_1 = arith.constant 0 : i32
    return %arg0, %c0_i32, %c0_i32_0 : i32, i32, i32
  }
  func.func @transform_1(%arg0: i32, %arg1: i32) -> (i32, i32, i32) {
    %c0_i32 = arith.constant 0 : i32
    %c0_i32_0 = arith.constant 0 : i32
    return %arg0, %c0_i32, %arg1 : i32, i32, i32
  }
  func.func @transform_2(%arg0: i32, %arg1: i32) -> (i32, i32, i32) {
    %c0_i32 = arith.constant 0 : i32
    %c0_i32_0 = arith.constant 0 : i32
    return %arg0, %c0_i32, %arg1 : i32, i32, i32
  }
}

</mosaic_0001>

<bundles_post_ra>
// kernel: tpu_custom_call.1
= control target key start
LH: loop header
LB: loop body
LE: loop exit
PB: predicated region body
PF: predicated region fallthrough
CT: control target
= control target key end

     0   :  { %7 = vsyncpa [#allocation3], 0  ;;  %s550_s0 = inlined_call_operand.hbm [shape: f32[4,8,8], index: 0, kind: input, shape index: {}]   ;;  %s551_s1 = inlined_call_operand.hbm [shape: f32[4,8,16], index: 1, kind: input, shape index: {}]   ;;  %s552_s2 = inlined_call_operand.hbm [shape: f32[4,8,16], index: 2, kind: output, shape index: {}]  }
   0x1   :  { %8 = vsyncpa [#allocation6], 0 }
   0x2   :  { %9 = vsyncpa [#allocation4], 0  ;;  %s475_s9 = smov [#allocation2]   ;;  %s403_s13 = scalar_lea.hbm %s550_s0, 512 }
   0x3   :  { %s15_s10 = sshll.u32 %s475_s9, 4  ;;  %p404_p0 = scmp.ne.s32.totalorder %s550_s0, %s403_s13  ;;  %s16_s10 = int_to_ptr.vmem [resolvable:$true] %s15_s10 }
   0x4   :  { %p407_p1 = scmp.lt.u32.totalorder %s403_s13, %s550_s0 }
   0x6   :  { %p409_p2 = pnand %p407_p1, %p404_p0 }
   0x8   :  { %412 = shalt.err (!%p409_p2)
}
   0x9   :  { %s413_s18 = scalar_lea.vmem %s16_s10, 512  ;;  %p418_p4 = scmp.lt.s32.totalorder %s16_s10, %s16_s10 }
   0xa   :  { %p414_p3 = scmp.ne.s32.totalorder %s16_s10, %s413_s18  ;;  %p419_p5 = scmp.lt.s32.totalorder %s413_s18, %s413_s18 }
   0xc   :  { %p420_p6 = por %p419_p5, %p418_p4 }
   0xe   :  { %p421_p7 = pnand %p420_p6, %p414_p3 }
  0x10   :  { %424 = shalt.err (!%p421_p7)
}
  0x11   :  { %s476_s19 = smov 128   ;;  %s477_s20 = smov 8  }
  0x12   :  { %21 = dma.hbm_to_vmem [thread:$0]  %s550_s0, 512, %s16_s10, [#allocation3], %s476_s19, %s476_s19, %s477_s20  }
  0x13   :  { %s478_s23 = smov [#allocation5]   ;;  %s425_s27 = scalar_lea.hbm %s551_s1, 512 }
  0x14   :  { %s27_s24 = sshll.u32 %s478_s23, 4  ;;  %p426_p8 = scmp.ne.s32.totalorder %s551_s1, %s425_s27  ;;  %s28_s24 = int_to_ptr.vmem [resolvable:$true] %s27_s24 }
  0x15   :  { %p429_p9 = scmp.lt.u32.totalorder %s425_s27, %s551_s1 }
  0x17   :  { %p431_p10 = pnand %p429_p9, %p426_p8 }
  0x19   :  { %434 = shalt.err (!%p431_p10)
}
  0x1a   :  { %s435_s4 = scalar_lea.vmem %s28_s24, 512  ;;  %p440_p12 = scmp.lt.s32.totalorder %s28_s24, %s28_s24 }
  0x1b   :  { %p436_p11 = scmp.ne.s32.totalorder %s28_s24, %s435_s4  ;;  %p441_p13 = scmp.lt.s32.totalorder %s435_s4, %s435_s4 }
  0x1d   :  { %p442_p0 = por %p441_p13, %p440_p12 }
  0x1f   :  { %p443_p1 = pnand %p442_p0, %p436_p11 }
  0x21   :  { %446 = shalt.err (!%p443_p1)
}
  0x22   :  { %33 = dma.hbm_to_vmem [thread:$0]  %s551_s1, 512, %s28_s24, [#allocation6], %s476_s19, %s476_s19, %s477_s20  }
  0x23   :  { %469 = dma.done.wait [#allocation3], 512  }
  0x24   :  { %470 = vsyncadd [#allocation3], 4294966784 }
  0x25   :  { %471 = dma.done.wait [#allocation6], 512  }
  0x26   :  { %472 = vsyncadd [#allocation6], 4294966784  ;;  %v479_v0 = vmov 0.0   ;;  %vm480_vm0 = vmmov 0   ;;  %vm48_vm1 = vcmask 64512   ;;  %v44_v1 = vld [vmem:[#allocation5] sm:$0xff] }
  0x27   :  { %376 = vmatprep.subr.mxu0 %v479_v0  ;;  %381 = vmatprep.subr.mxu1 %v479_v0  ;;  %v45_v2 = vld [vmem:[#allocation5 + $0x8] sm:$0xff]  ;;  %v40_v3 = vld [vmem:[#allocation2] sm:$0xff]  ;;  %v46_v5 = vld [vmem:[#allocation5 + $0x10] sm:$0xff]  ;;  %vm341_vm2 = vcmask 130048   ;;  %s481_s1 = smov [#allocation7]  }
  0x28   :  { %378 = vmatprep.mubr.msk.f32.mxu0 %vm480_vm0, %v479_v0  ;;  %383 = vmatprep.mubr.msk.f32.mxu1 %vm480_vm0, %v479_v0  ;;  %v41_v4 = vld [vmem:[#allocation2 + $0x8] sm:$0xff]  ;;  %v47_v6 = vld [vmem:[#allocation5 + $0x18] sm:$0xff]  ;;  %v42_v7 = vld [vmem:[#allocation2 + $0x10] sm:$0xff]  ;;  %s351_s6 = sshll.u32 %s481_s1, 4  ;;  %s352_s6 = int_to_ptr.vmem [resolvable:$true] %s351_s6 }
  0x29   :  { %377 = vmatpush3.msra.mxu0 %v44_v1  ;;  %382 = vmatpush3.msra.mxu1 %v45_v2  ;;  %v43_v8 = vld [vmem:[#allocation2 + $0x18] sm:$0xff]  ;;  %s447_s7 = scalar_lea.vmem %s352_s6, 512  ;;  %p452_p3 = scmp.lt.s32.totalorder %s352_s6, %s352_s6 }
  0x2a   :  { %379 = vmatmul.mubr.msk.f32.vlgmr.msra.gmra.mrb[0].mxu0 %vm48_vm1, %v40_v3  ;;  %384 = vmatmul.mubr.msk.f32.vlgmr.msra.gmra.mrb[0].mxu1 %vm48_vm1, %v41_v4  ;;  %p448_p2 = scmp.ne.s32.totalorder %s352_s6, %s447_s7  ;;  %p453_p4 = scmp.lt.s32.totalorder %s447_s7, %s447_s7 }
  0x2b   :  { %386 = vmatprep.subr.mxu0 %v479_v0  ;;  %391 = vmatprep.subr.mxu1 %v479_v0 }
  0x2c   :  { %387 = vmatpush3.msra.mxu0 %v46_v5  ;;  %392 = vmatpush3.msra.mxu1 %v47_v6  ;;  %p454_p5 = por %p453_p4, %p452_p3 }
  0x2d   :  { %388 = vmatprep.mubr.msk.f32.mxu0 %vm480_vm0, %v479_v0  ;;  %393 = vmatprep.mubr.msk.f32.mxu1 %vm480_vm0, %v479_v0 }
  0x2e   :  { %389 = vmatmul.mubr.msk.f32.vlgmr.msra.gmra.mrb[2].mxu0 %vm48_vm1, %v42_v7  ;;  %394 = vmatmul.mubr.msk.f32.vlgmr.msra.gmra.mrb[2].mxu1 %vm48_vm1, %v43_v8  ;;  %p455_p6 = pnand %p454_p5, %p448_p2 }
  0xfd   :  { %v118_v9 = vpop.f32.mrb[0].mxu0  ;;  %v191_v10 = vpop.f32.mrb[0].mxu1 }
  0xfe   :  { %342 = vst.msk [vmem:[#allocation7] sm:$0xff] %vm341_vm2, %v118_v9  ;;  %343 = vst.msk [vmem:[#allocation7 + $0x8] sm:$0xff] %vm341_vm2, %v191_v10  ;;  %v380_v11 = vpop.f32.mrb[1].mxu0  ;;  %v385_v12 = vpop.f32.mrb[1].mxu1 }
 0x101   :  { %v264_v13 = vpop.f32.mrb[2].mxu0  ;;  %v337_v14 = vpop.f32.mrb[2].mxu1 }
 0x102   :  { %344 = vst.msk [vmem:[#allocation7 + $0x10] sm:$0xff] %vm341_vm2, %v264_v13  ;;  %345 = vst.msk [vmem:[#allocation7 + $0x18] sm:$0xff] %vm341_vm2, %v337_v14  ;;  %v390_v15 = vpop.f32.mrb[3].mxu0  ;;  %v395_v16 = vpop.f32.mrb[3].mxu1 }
 0x103   :  { %458 = shalt.err (!%p455_p6)
}
 0x104   :  { %s459_s10 = scalar_lea.hbm %s552_s2, 512 }
 0x105   :  { %p460_p7 = scmp.ne.s32.totalorder %s552_s2, %s459_s10  ;;  %p463_p8 = scmp.lt.u32.totalorder %s459_s10, %s552_s2 }
 0x107   :  { %p465_p9 = pnand %p463_p8, %p460_p7 }
 0x109   :  { %468 = shalt.err (!%p465_p9)
}
 0x10a   :  { %357 = dma.vmem_to_hbm [thread:$0]  %s352_s6, 512, %s552_s2, [#allocation4], %s476_s19, %s476_s19, %s477_s20  }
 0x10b   :  { %473 = dma.done.wait [#allocation4], 512  }
 0x10c   :  { %474 = vsyncadd [#allocation4], 4294966784 }
 0x10d   :  { %361 = vsyncpa [#allocation3], 1 }
 0x10e   :  { %362 = vsyncpa [#allocation6], 1 }
 0x10f   :  { %363 = vsyncpa [#allocation4], 1 }

</bundles_post_ra>
